<compile_context>
chip_gen: v7x
topology: tpu7x:2x2x1
jax: 0.10.0
libtpu: 0.0.40
codegen_flags: <defaults>
</compile_context>

<pallas_src>
import functools

import jax
import jax.numpy as jnp
from jax.experimental import pallas as pl
from jax.experimental.pallas import tpu as pltpu


def _round_up(v, m):
    return (v + m - 1) // m * m


def mlp_kernel(x_ref, w1_ref, b1_ref, w2_ref, b2_ref, o_ref, *, use_bf16):
    # ---- Layer 1 on the MXU: (TILE_B, n) @ (n, H_pad), f32 accumulation ----
    x = x_ref[...]
    w1 = w1_ref[...]
    if use_bf16:  # bf16-native MXU path for large problems; accumulate stays f32
        x = x.astype(jnp.bfloat16)
        w1 = w1.astype(jnp.bfloat16)
    h = jnp.dot(x, w1, preferred_element_type=jnp.float32)
    h = jnp.maximum(h + b1_ref[...], 0.0)  # bias + ReLU on the VPU, f32 (v5e-safe)

    # ---- Layer 2 (out_features == 1): skip the MXU entirely ----
    # Elementwise multiply by the (1, H_pad) weight row (VPU) + lane reduce (XLU).
    # Padded lanes of w2 are zero, so they contribute exactly 0.
    z = jnp.sum(h * w2_ref[...], axis=-1, keepdims=True)  # (TILE_B, 1)
    z = z + b2_ref[0, 0]                                   # scalar bias from SMEM
    o_ref[...] = jax.nn.sigmoid(z).astype(o_ref.dtype)


def mlp_forward(x, w1, b1, w2, b2, *, tile_b=None, use_bf16=False):
    """Pallas forward pass: sigmoid(relu(x @ w1 + b1) @ w2 + b2).

    x : (B, n) float32
    w1: (n, H) float32  (transpose of nn.Linear.weight), H = 2n + 1
    b1: (H,) or (1, H)
    w2: (H, 1) or (H,)
    b2: scalar-shaped (any of (), (1,), (1, 1))
    Returns (B, 1) float32.
    """
    B, n = x.shape
    H = w1.shape[1]

    # --- wrapper-side layout plumbing (free; keeps the kernel lane-friendly) ---
    H_pad = _round_up(H, 128)  # 2n+1 is never lane-aligned; pad with zeros (exact)
    w1p = jnp.zeros((n, H_pad), jnp.float32).at[:, :H].set(w1.astype(jnp.float32))
    b1p = jnp.zeros((1, H_pad), jnp.float32).at[:, :H].set(
        jnp.reshape(b1, (1, H)).astype(jnp.float32))
    w2p = jnp.zeros((1, H_pad), jnp.float32).at[:, :H].set(
        jnp.reshape(w2, (1, H)).astype(jnp.float32))
    b2p = jnp.reshape(b2, (1, 1)).astype(jnp.float32)

    if tile_b is None:
        # 512-row tiles amortize the ~0.35us/step overhead while the working set
        # (double-buffered x tile + resident weights + h in vregs) stays far below
        # VMEM on every generation, including v7x's 64 MiB.
        tile_b = min(512, _round_up(B, 8))
    B_pad = _round_up(B, tile_b)
    xp = x if B_pad == B else jnp.zeros((B_pad, n), x.dtype).at[:B, :].set(x)

    grid = (B_pad // tile_b,)
    out = pl.pallas_call(
        functools.partial(mlp_kernel, use_bf16=use_bf16),
        out_shape=jax.ShapeDtypeStruct((B_pad, 1), jnp.float32),
        grid=grid,
        in_specs=[
            # Batch-tiled input: auto double-buffered / pipelined across the grid.
            pl.BlockSpec((tile_b, n), lambda i: (i, 0)),
            # Weights & biases: constant index map -> stay resident in VMEM.
            pl.BlockSpec((n, H_pad), lambda i: (0, 0)),
            pl.BlockSpec((1, H_pad), lambda i: (0, 0)),
            pl.BlockSpec((1, H_pad), lambda i: (0, 0)),
            # Scalar output bias lives in SMEM (no vector load / vreg wasted).
            pl.BlockSpec(memory_space=pltpu.MemorySpace.SMEM),
        ],
        out_specs=pl.BlockSpec((tile_b, 1), lambda i: (i, 0)),
        compiler_params=pltpu.CompilerParams(
            dimension_semantics=("parallel",),  # megacore batch split on v7x
        ),
    )(xp, w1p, b1p, w2p, b2p)
    return out[:B]


def init_params(key, n):
    """Deterministic init mirroring nn.Linear defaults: U(-1/sqrt(fan_in), +1/sqrt(fan_in))."""
    H = 2 * n + 1
    k1, k2, k3, k4 = jax.random.split(key, 4)
    bound1 = 1.0 / jnp.sqrt(n)
    bound2 = 1.0 / jnp.sqrt(H)
    w1 = jax.random.uniform(k1, (n, H), jnp.float32, -bound1, bound1)
    b1 = jax.random.uniform(k2, (1, H), jnp.float32, -bound1, bound1)
    w2 = jax.random.uniform(k3, (H, 1), jnp.float32, -bound2, bound2)
    b2 = jax.random.uniform(k4, (1, 1), jnp.float32, -bound2, bound2)
    return w1, b1, w2, b2


if __name__ == "__main__":
    key = jax.random.PRNGKey(0)
    n = 32        # MLP feature dim -> hidden = 2n+1 = 65 (padded to 128 in-kernel)
    batch = 20    # small batch, deliberately not a multiple of the tile size
    kx, kp = jax.random.split(key)
    x = jax.random.normal(kx, (batch, n), jnp.float32)
    w1, b1, w2, b2 = init_params(kp, n)

    # tile_b=8 -> B padded to 24, grid=(3,): exercises the pipelined batch grid
    # and the batch-padding / output-slice path at a toy size.
    out = mlp_forward(x, w1, b1, w2, b2, tile_b=8, use_bf16=False)
    out = jax.block_until_ready(out)

    # Reference in plain JAX (same math, unpadded weights).
    ref = jax.nn.sigmoid(jnp.maximum(x @ w1 + b1, 0.0) @ w2 + b2)
    assert out.shape == (batch, 1)
    assert jnp.allclose(out, ref, atol=1e-5), "mismatch vs reference"

    print("KERNEL_OK")
</pallas_src>

<mosaic_0001>
module attributes {stable_mosaic.version = 11 : i64} {
  func.func @mlp_kernel(%arg0: i32, %arg1: memref<8x32xf32, #tpu.memory_space<vmem>>, %arg2: memref<32x128xf32, #tpu.memory_space<vmem>>, %arg3: memref<1x128xf32, #tpu.memory_space<vmem>>, %arg4: memref<1x128xf32, #tpu.memory_space<vmem>>, %arg5: memref<1x1xf32, #tpu.memory_space<smem>>, %arg6: memref<8x1xf32, #tpu.memory_space<vmem>>) attributes {dimension_semantics = [#tpu.dimension_semantics<parallel>], iteration_bounds = array<i64: 3>, scalar_prefetch = 0 : i64, scratch_operands = 0 : i64, tpu.core_type = #tpu.core_type<tc>, window_params = [{transform_indices = @transform_0, window_bounds = array<i64: 8, 32>}, {pipeline_mode = #tpu.pipeline_mode<synchronous>, transform_indices = @transform_1, window_bounds = array<i64: 32, 128>}, {pipeline_mode = #tpu.pipeline_mode<synchronous>, transform_indices = @transform_2, window_bounds = array<i64: 1, 128>}, {pipeline_mode = #tpu.pipeline_mode<synchronous>, transform_indices = @transform_3, window_bounds = array<i64: 1, 128>}, {transform_indices = @transform_4, window_bounds = array<i64: 1, 1>}, {transform_indices = @transform_5, window_bounds = array<i64: 8, 1>}]} {
    %c0 = arith.constant 0 : index
    %c0_0 = arith.constant 0 : index
    %0 = vector.load %arg1[%c0, %c0_0] : memref<8x32xf32, #tpu.memory_space<vmem>>, vector<8x32xf32>
    %c0_1 = arith.constant 0 : index
    %c0_2 = arith.constant 0 : index
    %1 = vector.load %arg2[%c0_1, %c0_2] : memref<32x128xf32, #tpu.memory_space<vmem>>, vector<32x128xf32>
    %cst = arith.constant dense<0.000000e+00> : vector<8x128xf32>
    %2 = tpu.matmul %0, %1, %cst {dimension_numbers = #tpu.dot_dimension_numbers<[1], [0], [0], [1], [0, 0, 1, 1], [], []>} : vector<8x32xf32>, vector<32x128xf32>, vector<8x128xf32> -> vector<8x128xf32>
    %c0_3 = arith.constant 0 : index
    %c0_4 = arith.constant 0 : index
    %3 = vector.load %arg3[%c0_3, %c0_4] : memref<1x128xf32, #tpu.memory_space<vmem>>, vector<1x128xf32>
    %4 = vector.broadcast %3 : vector<1x128xf32> to vector<8x128xf32>
    %5 = arith.addf %2, %4 : vector<8x128xf32>
    %cst_5 = arith.constant 0.000000e+00 : f32
    %6 = vector.broadcast %cst_5 : f32 to vector<8x128xf32>
    %7 = arith.maximumf %5, %6 : vector<8x128xf32>
    %c0_6 = arith.constant 0 : index
    %c0_7 = arith.constant 0 : index
    %8 = vector.load %arg4[%c0_6, %c0_7] : memref<1x128xf32, #tpu.memory_space<vmem>>, vector<1x128xf32>
    %9 = vector.broadcast %8 : vector<1x128xf32> to vector<8x128xf32>
    %10 = arith.mulf %7, %9 : vector<8x128xf32>
    %cst_8 = arith.constant dense<0.000000e+00> : vector<8xf32>
    %11 = vector.multi_reduction <add>, %10, %cst_8 [1] : vector<8x128xf32> to vector<8xf32>
    %12 = vector.shape_cast %11 : vector<8xf32> to vector<8x1xf32>
    %c0_9 = arith.constant 0 : index
    %c0_10 = arith.constant 0 : index
    %13 = memref.load %arg5[%c0_9, %c0_10] : memref<1x1xf32, #tpu.memory_space<smem>>
    %14 = vector.broadcast %13 : f32 to vector<8x1xf32>
    %15 = arith.addf %12, %14 : vector<8x1xf32>
    %16 = arith.negf %15 : vector<8x1xf32>
    %17 = math.exp %16 : vector<8x1xf32>
    %cst_11 = arith.constant 1.000000e+00 : f32
    %18 = vector.broadcast %cst_11 : f32 to vector<8x1xf32>
    %19 = arith.addf %18, %17 : vector<8x1xf32>
    %20 = arith.divf %18, %19 : vector<8x1xf32>
    %c0_12 = arith.constant 0 : index
    %c0_13 = arith.constant 0 : index
    %21 = vector.load %arg6[%c0_12, %c0_13] : memref<8x1xf32, #tpu.memory_space<vmem>>, vector<8x1xf32>
    tpu.vector_store %arg6[%c0_12, %c0_13], %20 {strides = array<i32>} : memref<8x1xf32, #tpu.memory_space<vmem>>, vector<8x1xf32>,
    return
  }
  func.func @transform_0(%arg0: i32) -> (i32, i32) {
    %c0_i32 = arith.constant 0 : i32
    %c0_i32_0 = arith.constant 0 : i32
    return %arg0, %c0_i32 : i32, i32
  }
  func.func @transform_1(%arg0: i32) -> (i32, i32) {
    %c0_i32 = arith.constant 0 : i32
    %c0_i32_0 = arith.constant 0 : i32
    %c0_i32_1 = arith.constant 0 : i32
    return %c0_i32, %c0_i32_0 : i32, i32
  }
  func.func @transform_2(%arg0: i32) -> (i32, i32) {
    %c0_i32 = arith.constant 0 : i32
    %c0_i32_0 = arith.constant 0 : i32
    %c0_i32_1 = arith.constant 0 : i32
    return %c0_i32, %c0_i32_0 : i32, i32
  }
  func.func @transform_3(%arg0: i32) -> (i32, i32) {
    %c0_i32 = arith.constant 0 : i32
    %c0_i32_0 = arith.constant 0 : i32
    %c0_i32_1 = arith.constant 0 : i32
    return %c0_i32, %c0_i32_0 : i32, i32
  }
  func.func @transform_4(%arg0: i32) -> (i32, i32) {
    %c0_i32 = arith.constant 0 : i32
    %c0_i32_0 = arith.constant 0 : i32
    %c0_i32_1 = arith.constant 0 : i32
    return %c0_i32, %c0_i32_0 : i32, i32
  }
  func.func @transform_5(%arg0: i32) -> (i32, i32) {
    %c0_i32 = arith.constant 0 : i32
    %c0_i32_0 = arith.constant 0 : i32
    return %arg0, %c0_i32 : i32, i32
  }
}

</mosaic_0001>

<bundles_post_ra>
// kernel: tpu_custom_call.1
= control target key start
LH: loop header
LB: loop body
LE: loop exit
PB: predicated region body
PF: predicated region fallthrough
CT: control target
= control target key end

     0   :  { %s819_s0 = inlined_call_operand.hbm [shape: f32[24,32], index: 0, kind: input, shape index: {}]   ;;  %s820_s1 = inlined_call_operand.hbm [shape: f32[32,128], index: 1, kind: input, shape index: {}]   ;;  %s821_s2 = inlined_call_operand.vmem [shape: f32[1,128], index: 2, kind: input, shape index: {}]   ;;  %s822_s3 = inlined_call_operand.vmem [shape: f32[1,128], index: 3, kind: input, shape index: {}]   ;;  %s823_s4 = inlined_call_operand.<no memory space> [shape: f32[1,1], index: 4, kind: input, shape index: {}]   ;;  %s824_s5 = inlined_call_operand.vmem [shape: f32[24,1], index: 5, kind: output, shape index: {}]  }
   0x1   :  { %10 = sst [smem:[#allocation2]] %s823_s4 }
   0x2   :  { %11 = vsyncpa [#allocation4], 0 }
   0x3   :  { %13 = vsyncpa [#allocation4 + $0x1], 0 }
   0x4   :  { %14 = vsyncpa [#allocation6], 0  ;;  %s674_s20 = smov 0   ;;  %s676_s21 = smov 0  }
   0x5   :  { %s678_s22 = smov 0   ;;  %s680_s23 = smov 0  }
   0x6 LB: > { %s693_s4 = sadd.s32 4294967295, %s632_s23   ;;  %p40_p0 = scmp.ne.s32.totalorder %s624_s21, %s620_s20  ;;  %s632_s23 = sphi %s680_s23, %s839_s23   ;;  %s628_s22 = sphi %s678_s22, %s838_s22   ;;  %s624_s21 = sphi %s676_s21, %s837_s21   ;;  %s620_s20 = sphi %s674_s20, %s836_s20  }
   0x7   : > { %p825_p1 = scmp.eq.s32.totalorder %s693_s4, 0  ;;  %p440_p2 = scmp.ge.s32.totalorder %s632_s23, 1 }
   0x8   : > { %p161_p3 = scmp.lt.s32.totalorder %s632_s23, 4  ;;  %s634_s26 = smov [#allocation5]  }
   0x9   : > { %p701_p4 = por %p825_p1, %p40_p0  ;;  %s173_s27 = sshll.u32 %s634_s26, 4  ;;  %s174_s27 = int_to_ptr.vmem [resolvable:$true] %s173_s27 }
   0xa   : > { %p705_p5 = pnand %p440_p2, %p161_p3  ;;  %s718_s29 = sadd.s32 1, %s632_s23  }
   0xb   : > { %s828_s24 = scalar_select %p701_p4, 1, 0 }
   0xc   : > { %s829_s25 = scalar_select %p705_p5, 1, 0 }
   0xd   : > { %p483_p6 = pneg %p705_p5  ;;  %s27_s30 = sadd.s32 1, %s628_s22 }
   0xe   : > { %s24_s6 = ssub.s32 %s632_s23, %s718_s29  ;;  %s536_s9 = scalar_lea.hbm %s820_s1, 512 }
   0xf   : > { %p713_p7 = pnand %p483_p6, %p825_p1  ;;  %p537_p8 = scmp.ne.s32.totalorder %s820_s1, %s536_s9 }
  0x10   : > { %p543_p12 = scmp.lt.u32.totalorder %s536_s9, %s820_s1 }
  0x11   : > { %p538_p9 = pneg %p713_p7 }
  0x13   : > { %p539_p10 = pnand %p538_p9, %p537_p8 }
  0x15   : > { %p540_p11 = pneg %p539_p10 }
  0x17   : > { %p545_p13 = pnand %p543_p12, %p540_p11 }
  0x19   : > { %548 = shalt.err (!%p545_p13)
}
  0x1a   : > { %s549_s14 = scalar_lea.vmem %s174_s27, 512  ;;  %p557_p6 = scmp.lt.s32.totalorder %s174_s27, %s174_s27 }
  0x1b   : > { %p550_p0 = scmp.ne.s32.totalorder %s174_s27, %s549_s14  ;;  %p558_p1 = scmp.lt.s32.totalorder %s549_s14, %s549_s14 }
  0x1d   : > { %p552_p2 = pnand %p550_p0, %p538_p9  ;;  %p559_p4 = por %p558_p1, %p557_p6 }
  0x1f   : > { %p553_p3 = pneg %p552_p2 }
  0x21   : > { %p560_p5 = pnand %p559_p4, %p553_p3 }
  0x23   : > { %563 = shalt.err (!%p560_p5)
}
  0x24   : > { %s635_s15 = smov 128   ;;  %s636_s16 = smov 8  }
  0x25   : > { %486 = dma.hbm_to_vmem [thread:$0]  (!%p713_p7), %s820_s1, 512, %s174_s27, [#allocation6], %s635_s15, %s635_s15, %s636_s16  }
  0x26   : > { %p25_p8 = scmp.eq.s32.totalorder %s24_s6, 0  ;;  %p34_p9 = scmp.ne.s32.totalorder %s628_s22, %s624_s21 }
  0x27   : > { %p35_p1 = scmp.eq.s32.totalorder %s632_s23, 0  ;;  %p492_p4 = scmp.lt.s32.totalorder %s632_s23, 3 }
  0x28   : > { %s744_s19 = scalar_select %p25_p8, %s628_s22, %s27_s30  }
  0x29   : > { %p36_p5 = por %p35_p1, %p34_p9  ;;  %s196_s20 = sand.u32 1, %s628_s22  }
  0x2a   : > { %s443_s26 = sshll.u32 %s196_s20, 3  ;;  %s444_s7 = sshll.u32 %s632_s23, 7 }
  0x2b   : > { %s751_s10 = scalar_lea.hbm %s819_s0, %s444_s7  ;;  %s200_s27 = scalar_lea.vmem [#allocation3], %s443_s26 }
  0x2c   : > { %s207_s28 = sshll.u32 %s200_s27, 4  ;;  %p755_p7 = pnand %p492_p4, %p36_p5  ;;  %s753_s28 = int_to_ptr.vmem [resolvable:$true] %s207_s28 }
  0x2d   : > { %s197_s23 = scalar_lea.sflag [#allocation4], %s196_s20  ;;  %s564_s6 = scalar_lea.hbm %s751_s10, 128 }
  0x2e   : > { %p565_p10 = scmp.ne.s32.totalorder %s751_s10, %s564_s6  ;;  %p566_p11 = pneg %p755_p7 }
  0x2f   : > { %s569_s13 = scalar_lea.hbm %s819_s0, 384  ;;  %p570_p0 = scmp.lt.u32.totalorder %s751_s10, %s819_s0 }
  0x30   : > { %p567_p12 = pnand %p566_p11, %p565_p10  ;;  %p571_p2 = scmp.lt.u32.totalorder %s569_s13, %s564_s6 }
  0x31   : > { %p573_p6 = scmp.lt.u32.totalorder %s564_s6, %s751_s10 }
  0x32   : > { %p568_p13 = pneg %p567_p12  ;;  %p572_p3 = por %p571_p2, %p570_p0 }
  0x34   : > { %p574_p8 = por %p573_p6, %p572_p3 }
  0x36   : > { %p575_p9 = pnand %p574_p8, %p568_p13 }
  0x38   : > { %578 = shalt.err (!%p575_p9)
}
  0x39   : > { %s579_s16 = scalar_lea.vmem %s753_s28, 128  ;;  %s637_s17 = smov [#allocation3]  }
  0x3a   : > { %p580_p1 = scmp.ne.s32.totalorder %s753_s28, %s579_s16  ;;  %s584_s18 = sshll.u32 %s637_s17, 4  ;;  %s585_s18 = int_to_ptr.vmem [resolvable:$false] %s584_s18 }
  0x3b   : > { %s586_s20 = scalar_lea.vmem %s585_s18, 256  ;;  %p587_p10 = scmp.lt.s32.totalorder %s753_s28, %s585_s18 }
  0x3c   : > { %p582_p4 = pnand %p580_p1, %p566_p11  ;;  %p588_p12 = scmp.lt.s32.totalorder %s586_s20, %s579_s16 }
  0x3e   : > { %p583_p5 = pneg %p582_p4  ;;  %p589_p0 = por %p588_p12, %p587_p10 }
  0x40   : > { %p590_p2 = pnand %p589_p0, %p583_p5 }
  0x42   : > { %593 = shalt.err (!%p590_p2)
}
  0x43   : > { %490 = dma.hbm_to_vmem [thread:$0]  (!%p755_p7), %s751_s10, 128, %s753_s28, %s197_s23  }
  0x44   : > { %p832_p13 = scmp.ne.s32.totalorder %s829_s25, 0 }
  0x45   : > { %s218_s26 = sand.u32 (!%p832_p13), 1, %s624_s21   ;;  %p833_p11 = scmp.ne.s32.totalorder (!%p832_p13), %s828_s24, 0 }
  0x46   : > { %216 = sbr.rel (%p832_p13) target bundleno = 480 (0x1e0), region = 40  ;;  %s446_s7 = sshll.u32 (!%p832_p13), %s218_s26, 3 }
  0x47   : > { %s219_s8 = scalar_lea.sflag (!%p832_p13), [#allocation4], %s218_s26  ;;  %s222_s9 = scalar_lea.vmem (!%p832_p13), [#allocation3], %s446_s7 }
  0x4d   : > { %611 = dma.done.wait (%p833_p11), %s219_s8, 128  }
  0x4e   : > { %613 = vsyncadd (%p833_p11), %s219_s8, 4294967168  ;;  %p834_p3 = scmp.eq.s32.totalorder %s693_s4, 0 }
  0x50   : > { %615 = dma.done.wait (%p834_p3), [#allocation6], 512   ;;  %p835_p6 = pmov %p834_p3 }
  0x51   : > { %v638_v0 = vmov 0.0|0.0   ;;  %vm639_vm0 = vmmov 0   ;;  %v640_v1 = vmov 0.0   ;;  %v257_v2 = vld [vmem:[#allocation5] sm:$0xff]  ;;  %v258_v3 = vld [vmem:[#allocation5 + $0x8] sm:$0xff]  ;;  %v259_v4 = vld [vmem:[#allocation5 + $0x10] sm:$0xff] }
  0x52   : > { %617 = vsyncadd (%p835_p6), [#allocation6], 4294966784  ;;  %471 = vmatprep.subr.bf16.mxu0 %v638_v0  ;;  %468 = vmatprep.mubr.msk.f32.mxu0 %vm639_vm0, %v640_v1  ;;  %v472_v5 = vpack.c.bf16 %v258_v3, %v257_v2  ;;  %v260_v6 = vld [vmem:[#allocation5 + $0x18] sm:$0xff]  ;;  %vm268_vm1 = vcmask 261120   ;;  %v449_v9 = vld [vmem:[%s821_s2] ss:$0 sm:$0xff] }
  0x53   : > { %v475_v7 = vpack.c.bf16 %v260_v6, %v259_v4  ;;  %v256_v8 = vld [vmem:[%s222_s9] sm:$0xff]  ;;  %s353_s28 = sld [smem:[#allocation2]]  ;;  %p252_p7 = scmp.lt.s32.totalorder %s693_s4, 2  ;;  %vm362_vm2 = vcmask 7168  }
  0x54   : > { %473 = vmatpush3.bf16.msra.mxu0 %v472_v5  ;;  %v451_v13 = vld [vmem:[%s822_s3] ss:$0 sm:$0xff] }
  0x55   : > { %474 = vmatprep.subr.bf16.mxu0 %v638_v0  ;;  %s841_s4 = smov (!%p252_p7, %s693_s4), 2 }
  0x56   : > { %s448_s30 = sshll.u32 %s841_s4, 3 }
  0x57   : > { %s255_s11 = scalar_lea.vmem %s824_s5, %s448_s30 }
  0x58   : > { %476 = vmatpush3.bf16.msra.mxu0 %v475_v7 }
  0x59   : > { %v354_v16 = vstv %s353_s28 }
  0x5b   : > { %469 = vmatmul.mubr.msk.f32.vlgmr.msra.gmra.mrb[0].mxu0 %vm268_vm1, %v256_v8 }
 0x12e   : > { %v338_v10 = vpop.f32.mrb[0].mxu0 }
 0x12f   : > { %v339_v11 = vadd.f32 %v449_v9, %v338_v10  ;;  %v470_v12 = vpop.f32.mrb[1].mxu0 }
 0x131   : > { %v342_v14 = vmax.f32 %v339_v11, 0.0 }
 0x133   : > { %v350_v15 = vmul.f32 %v451_v13, %v342_v14 }
 0x135   : > { %351 = vadd.xlane.f32.xlu0 %v350_v15 }
 0x1c2   : > { %v352_v17 = vpop.xlane.xlu0 %351 }
 0x1c3   : > { %v355_v18 = vadd.f32 %v354_v16, %v352_v17 }
 0x1c5   : > { %v452_v19 = vmul.f32 -1.442695, %v355_v18 }
 0x1c7   : > { %532 = vpow2.f32 %v452_v19 }
 0x1d1   : > { %v533_v20 = vpop.eup %532 }
 0x1d2   : > { %v359_v21 = vadd.f32 1.0, %v533_v20 }
 0x1d4   : > { %534 = vrcp.f32 %v359_v21 }
 0x1de   : > { %v535_v22 = vpop.eup %534 }
 0x1df   : > { %363 = vst.msk [vmem:[%s255_s11] sm:$0xff] %vm362_vm2, %v535_v22 }
 0x1e0 PF: > { %p17_p8 = scmp.ge.s32.totalorder %s718_s29, 5   ;;  %s836_s20 = smov %s624_s21 }
 0x1e1   : > { %s837_s21 = smov %s628_s22  ;;  %s838_s22 = smov %s744_s19 }
 0x1e2   : > { %s839_s23 = smov %s718_s29  ;;  %19 = sbr.rel (!%p17_p8) target bundleno = 6 (0x6), region = 84 }
 0x1e9   :  { %383 = vsyncpa [#allocation4], 1 }
 0x1ea   :  { %385 = vsyncpa [#allocation4 + $0x1], 1 }
 0x1eb   :  { %386 = vsyncpa [#allocation6], 1 }

</bundles_post_ra>
